<compile_context>
chip_gen: v7x
topology: tpu7x:2x2x1
jax: 0.10.0
libtpu: 0.0.40
codegen_flags: <defaults>
</compile_context>

<pallas_src>
import jax
import jax.numpy as jnp
from jax.experimental import pallas as pl
from jax.experimental.pallas import tpu as pltpu


def _round_up(x, m):
    return ((x + m - 1) // m) * m


def _actor_kernel(max_action):
    """Returns a kernel closure with max_action baked in as a compile-time constant."""

    def kernel(state_ref, w1_ref, b1_ref, w2_ref, b2_ref, w3_ref, b3_ref, out_ref):
        # Layer 1: Linear(state_dim -> H1) + ReLU.  bf16 MXU inputs, fp32 accumulate.
        x = jnp.dot(state_ref[...].astype(jnp.bfloat16), w1_ref[...],
                    preferred_element_type=jnp.float32)
        # fp32 bias+ReLU (v5e-safe), store the intermediate as bf16 for the next MXU pass.
        x = jnp.maximum(x + b1_ref[...], 0.0).astype(jnp.bfloat16)

        # Layer 2: Linear(H1 -> H2) + ReLU.
        x = jnp.dot(x, w2_ref[...], preferred_element_type=jnp.float32)
        x = jnp.maximum(x + b2_ref[...], 0.0).astype(jnp.bfloat16)

        # Layer 3: Linear(H2 -> A_pad), tanh (EUP), scale by max_action, bf16 store.
        x = jnp.dot(x, w3_ref[...], preferred_element_type=jnp.float32)
        out_ref[...] = (jnp.tanh(x + b3_ref[...]) * max_action).astype(out_ref.dtype)

    return kernel


def init_actor_params(key, state_dim, action_dim):
    """Deterministic synthetic parameter init (matches nn.Linear shapes, transposed:
    weights are (in_features, out_features), biases (1, out_features), all fp32)."""
    k1, k2, k3, k4, k5, k6 = jax.random.split(key, 6)

    def lin(kw, kb, fan_in, fan_out):
        bound = 1.0 / jnp.sqrt(fan_in)
        w = jax.random.uniform(kw, (fan_in, fan_out), jnp.float32, -bound, bound)
        b = jax.random.uniform(kb, (1, fan_out), jnp.float32, -bound, bound)
        return w, b

    w1, b1 = lin(k1, k2, state_dim, 400)
    w2, b2 = lin(k3, k4, 400, 300)
    w3, b3 = lin(k5, k6, 300, action_dim)
    return {"w1": w1, "b1": b1, "w2": w2, "b2": b2, "w3": w3, "b3": b3}


def prepare_actor_params(params):
    """One-time prep: zero-pad widths to multiples of 128 and cast weights to bf16.

    Trained PyTorch weights must be zero-PADDED (never truncated) to stay
    numerically equivalent to the original module."""
    def pad2(a, rows, cols):
        return jnp.pad(a, ((0, rows - a.shape[0]), (0, cols - a.shape[1])))

    sd, h1 = params["w1"].shape
    h2 = params["w2"].shape[1]
    ad = params["w3"].shape[1]
    H1, H2, AP = _round_up(h1, 128), _round_up(h2, 128), _round_up(ad, 128)

    return {
        "w1": pad2(params["w1"], sd, H1).astype(jnp.bfloat16),
        "b1": pad2(params["b1"], 1, H1),                       # biases stay fp32
        "w2": pad2(params["w2"], H1, H2).astype(jnp.bfloat16),
        "b2": pad2(params["b2"], 1, H2),
        "w3": pad2(params["w3"], H2, AP).astype(jnp.bfloat16),
        "b3": pad2(params["b3"], 1, AP),
    }


def actor_forward(state, padded_params, max_action, action_dim, tile_b=512):
    """Pallas-backed Actor forward.

    state: (B, state_dim) fp32.  padded_params: output of prepare_actor_params.
    Returns (B, action_dim) fp32 == tanh(relu(relu(s@W1+b1)@W2+b2)@W3+b3)*max_action
    (modulo the documented bf16 weight/activation quantization).
    """
    p = padded_params
    B, state_dim = state.shape
    H1 = p["w1"].shape[1]
    H2 = p["w2"].shape[1]
    AP = p["w3"].shape[1]

    # ---- batch tiling -----------------------------------------------------
    # Rows padded to a sublane multiple; tiles split EVENLY over the padded
    # batch (no mostly-empty last tile), and >=2 tiles whenever B > 8 so both
    # v7x TensorCores get work via the "parallel" grid axis.
    b_min = _round_up(B, 8)
    tile_b = min(tile_b, b_min)
    num_tiles = pl.cdiv(b_min, tile_b)
    if B > 8:
        num_tiles = max(num_tiles, 2)
    tile_b = _round_up(pl.cdiv(b_min, num_tiles), 8)
    num_tiles = pl.cdiv(b_min, tile_b)
    b_pad = num_tiles * tile_b
    if b_pad != B:
        state = jnp.pad(state, ((0, b_pad - B), (0, 0)))
    grid = (num_tiles,)

    # state/out walk the batch; weights/biases use constant index_maps so they
    # stay VMEM-resident across all batch tiles (loaded once).
    in_specs = [
        pl.BlockSpec((tile_b, state_dim), lambda i: (i, 0)),   # state tile
        pl.BlockSpec((state_dim, H1), lambda i: (0, 0)),       # w1 (resident)
        pl.BlockSpec((1, H1), lambda i: (0, 0)),               # b1
        pl.BlockSpec((H1, H2), lambda i: (0, 0)),              # w2
        pl.BlockSpec((1, H2), lambda i: (0, 0)),               # b2
        pl.BlockSpec((H2, AP), lambda i: (0, 0)),              # w3
        pl.BlockSpec((1, AP), lambda i: (0, 0)),               # b3
    ]
    out_specs = pl.BlockSpec((tile_b, AP), lambda i: (i, 0))

    weight_bytes = sum(int(p[k].size) * p[k].dtype.itemsize
                       for k in ("w1", "b1", "w2", "b2", "w3", "b3"))
    cost = pl.CostEstimate(
        flops=2 * b_pad * (state_dim * H1 + H1 * H2 + H2 * AP),
        transcendentals=b_pad * AP,
        bytes_accessed=b_pad * state_dim * 4 + weight_bytes + b_pad * AP * 2,
    )

    out_padded = pl.pallas_call(
        _actor_kernel(float(max_action)),
        out_shape=jax.ShapeDtypeStruct((b_pad, AP), jnp.bfloat16),
        grid=grid,
        in_specs=in_specs,
        out_specs=out_specs,
        compiler_params=pltpu.CompilerParams(
            dimension_semantics=("parallel",)),
        cost_estimate=cost,
    )(state, p["w1"], p["b1"], p["w2"], p["b2"], p["w3"], p["b3"])

    return out_padded[:B, :action_dim].astype(jnp.float32)


def _bf16_reference(state, padded, max_action, batch, action_dim):
    """Pure-JAX mirror of the kernel math (bf16 MXU inputs / intermediates,
    fp32 accumulation, bf16 output store)."""
    s16 = state.astype(jnp.bfloat16)
    x = jnp.maximum(jnp.dot(s16, padded["w1"], preferred_element_type=jnp.float32)
                    + padded["b1"], 0.0).astype(jnp.bfloat16)
    x = jnp.maximum(jnp.dot(x, padded["w2"], preferred_element_type=jnp.float32)
                    + padded["b2"], 0.0).astype(jnp.bfloat16)
    y = (jnp.tanh(jnp.dot(x, padded["w3"], preferred_element_type=jnp.float32)
                  + padded["b3"]) * max_action)
    return y.astype(jnp.bfloat16).astype(jnp.float32)[:batch, :action_dim]


if __name__ == "__main__":
    key = jax.random.PRNGKey(0)
    k_params, k_state, k_state2 = jax.random.split(key, 3)

    state_dim = 16
    action_dim = 4
    max_action = 2.0
    batch = 2

    params = init_actor_params(k_params, state_dim, action_dim)
    padded = prepare_actor_params(params)
    state = jax.random.normal(k_state, (batch, state_dim), jnp.float32)

    out = actor_forward(state, padded, max_action, action_dim)
    out = jax.block_until_ready(out)
    assert out.shape == (batch, action_dim)
    assert out.dtype == jnp.float32

    # Reference 1: bf16 mirror of the kernel math.
    ref_bf16 = _bf16_reference(state, padded, max_action, batch, action_dim)
    assert jnp.allclose(out, ref_bf16, atol=2e-2, rtol=1e-2), "mismatch vs bf16 reference"

    # Reference 2: full-fp32 unpadded reference (original PyTorch semantics), loose tol
    # to cover the deliberate bf16 weight/activation/output quantization.
    xf = jnp.maximum(state @ params["w1"] + params["b1"], 0.0)
    xf = jnp.maximum(xf @ params["w2"] + params["b2"], 0.0)
    ref_f32 = jnp.tanh(xf @ params["w3"] + params["b3"]) * max_action
    assert jnp.allclose(out, ref_f32, atol=1e-1), "mismatch vs fp32 reference"

    # Smoke-test the multi-tile / uneven-batch path (B=300 -> 2 even tiles of 152).
    batch2 = 300
    state2 = jax.random.normal(k_state2, (batch2, state_dim), jnp.float32)
    out2 = jax.block_until_ready(actor_forward(state2, padded, max_action, action_dim))
    assert out2.shape == (batch2, action_dim)
    ref2 = _bf16_reference(state2, padded, max_action, batch2, action_dim)
    assert jnp.allclose(out2, ref2, atol=2e-2, rtol=1e-2), "mismatch vs bf16 reference (B=300)"

    print("KERNEL_OK")
</pallas_src>

<mosaic_0001>
module attributes {stable_mosaic.version = 11 : i64} {
  func.func @kernel(%arg0: i32, %arg1: memref<8x16xf32, #tpu.memory_space<vmem>>, %arg2: memref<16x512xbf16, #tpu.memory_space<vmem>>, %arg3: memref<1x512xf32, #tpu.memory_space<vmem>>, %arg4: memref<512x384xbf16, #tpu.memory_space<vmem>>, %arg5: memref<1x384xf32, #tpu.memory_space<vmem>>, %arg6: memref<384x128xbf16, #tpu.memory_space<vmem>>, %arg7: memref<1x128xf32, #tpu.memory_space<vmem>>, %arg8: memref<8x128xbf16, #tpu.memory_space<vmem>>) attributes {dimension_semantics = [#tpu.dimension_semantics<parallel>], iteration_bounds = array<i64: 1>, scalar_prefetch = 0 : i64, scratch_operands = 0 : i64, tpu.core_type = #tpu.core_type<tc>, window_params = [{transform_indices = @transform_0, window_bounds = array<i64: 8, 16>}, {pipeline_mode = #tpu.pipeline_mode<synchronous>, transform_indices = @transform_1, window_bounds = array<i64: 16, 512>}, {pipeline_mode = #tpu.pipeline_mode<synchronous>, transform_indices = @transform_2, window_bounds = array<i64: 1, 512>}, {pipeline_mode = #tpu.pipeline_mode<synchronous>, transform_indices = @transform_3, window_bounds = array<i64: 512, 384>}, {pipeline_mode = #tpu.pipeline_mode<synchronous>, transform_indices = @transform_4, window_bounds = array<i64: 1, 384>}, {pipeline_mode = #tpu.pipeline_mode<synchronous>, transform_indices = @transform_5, window_bounds = array<i64: 384, 128>}, {pipeline_mode = #tpu.pipeline_mode<synchronous>, transform_indices = @transform_6, window_bounds = array<i64: 1, 128>}, {transform_indices = @transform_7, window_bounds = array<i64: 8, 128>}]} {
    %c0 = arith.constant 0 : index
    %c0_0 = arith.constant 0 : index
    %0 = vector.load %arg1[%c0, %c0_0] : memref<8x16xf32, #tpu.memory_space<vmem>>, vector<8x16xf32>
    %1 = arith.truncf %0 : vector<8x16xf32> to vector<8x16xbf16>
    %c0_1 = arith.constant 0 : index
    %c0_2 = arith.constant 0 : index
    %2 = vector.load %arg2[%c0_1, %c0_2] : memref<16x512xbf16, #tpu.memory_space<vmem>>, vector<16x512xbf16>
    %cst = arith.constant dense<0.000000e+00> : vector<8x512xf32>
    %3 = tpu.matmul %1, %2, %cst {dimension_numbers = #tpu.dot_dimension_numbers<[1], [0], [0], [1], [0, 0, 1, 1], [], []>} : vector<8x16xbf16>, vector<16x512xbf16>, vector<8x512xf32> -> vector<8x512xf32>
    %c0_3 = arith.constant 0 : index
    %c0_4 = arith.constant 0 : index
    %4 = vector.load %arg3[%c0_3, %c0_4] : memref<1x512xf32, #tpu.memory_space<vmem>>, vector<1x512xf32>
    %5 = vector.broadcast %4 : vector<1x512xf32> to vector<8x512xf32>
    %6 = arith.addf %3, %5 : vector<8x512xf32>
    %cst_5 = arith.constant 0.000000e+00 : f32
    %7 = vector.broadcast %cst_5 : f32 to vector<8x512xf32>
    %8 = arith.maximumf %6, %7 : vector<8x512xf32>
    %9 = arith.truncf %8 : vector<8x512xf32> to vector<8x512xbf16>
    %c0_6 = arith.constant 0 : index
    %c0_7 = arith.constant 0 : index
    %10 = vector.load %arg4[%c0_6, %c0_7] : memref<512x384xbf16, #tpu.memory_space<vmem>>, vector<512x384xbf16>
    %cst_8 = arith.constant dense<0.000000e+00> : vector<8x384xf32>
    %11 = tpu.matmul %9, %10, %cst_8 {dimension_numbers = #tpu.dot_dimension_numbers<[1], [0], [0], [1], [0, 0, 1, 1], [], []>} : vector<8x512xbf16>, vector<512x384xbf16>, vector<8x384xf32> -> vector<8x384xf32>
    %c0_9 = arith.constant 0 : index
    %c0_10 = arith.constant 0 : index
    %12 = vector.load %arg5[%c0_9, %c0_10] : memref<1x384xf32, #tpu.memory_space<vmem>>, vector<1x384xf32>
    %13 = vector.broadcast %12 : vector<1x384xf32> to vector<8x384xf32>
    %14 = arith.addf %11, %13 : vector<8x384xf32>
    %cst_11 = arith.constant 0.000000e+00 : f32
    %15 = vector.broadcast %cst_11 : f32 to vector<8x384xf32>
    %16 = arith.maximumf %14, %15 : vector<8x384xf32>
    %17 = arith.truncf %16 : vector<8x384xf32> to vector<8x384xbf16>
    %c0_12 = arith.constant 0 : index
    %c0_13 = arith.constant 0 : index
    %18 = vector.load %arg6[%c0_12, %c0_13] : memref<384x128xbf16, #tpu.memory_space<vmem>>, vector<384x128xbf16>
    %cst_14 = arith.constant dense<0.000000e+00> : vector<8x128xf32>
    %19 = tpu.matmul %17, %18, %cst_14 {dimension_numbers = #tpu.dot_dimension_numbers<[1], [0], [0], [1], [0, 0, 1, 1], [], []>} : vector<8x384xbf16>, vector<384x128xbf16>, vector<8x128xf32> -> vector<8x128xf32>
    %c0_15 = arith.constant 0 : index
    %c0_16 = arith.constant 0 : index
    %20 = vector.load %arg7[%c0_15, %c0_16] : memref<1x128xf32, #tpu.memory_space<vmem>>, vector<1x128xf32>
    %21 = vector.broadcast %20 : vector<1x128xf32> to vector<8x128xf32>
    %22 = arith.addf %19, %21 : vector<8x128xf32>
    %23 = math.tanh %22 : vector<8x128xf32>
    %cst_17 = arith.constant 2.000000e+00 : f32
    %24 = vector.broadcast %cst_17 : f32 to vector<8x128xf32>
    %25 = arith.mulf %23, %24 : vector<8x128xf32>
    %26 = arith.truncf %25 : vector<8x128xf32> to vector<8x128xbf16>
    %c0_18 = arith.constant 0 : index
    %c0_19 = arith.constant 0 : index
    %27 = vector.load %arg8[%c0_18, %c0_19] : memref<8x128xbf16, #tpu.memory_space<vmem>>, vector<8x128xbf16>
    tpu.vector_store %arg8[%c0_18, %c0_19], %26 {strides = array<i32>} : memref<8x128xbf16, #tpu.memory_space<vmem>>, vector<8x128xbf16>,
    return
  }
  func.func @transform_0(%arg0: i32) -> (i32, i32) {
    %c0_i32 = arith.constant 0 : i32
    %c0_i32_0 = arith.constant 0 : i32
    return %arg0, %c0_i32 : i32, i32
  }
  func.func @transform_1(%arg0: i32) -> (i32, i32) {
    %c0_i32 = arith.constant 0 : i32
    %c0_i32_0 = arith.constant 0 : i32
    %c0_i32_1 = arith.constant 0 : i32
    return %c0_i32, %c0_i32_0 : i32, i32
  }
  func.func @transform_2(%arg0: i32) -> (i32, i32) {
    %c0_i32 = arith.constant 0 : i32
    %c0_i32_0 = arith.constant 0 : i32
    %c0_i32_1 = arith.constant 0 : i32
    return %c0_i32, %c0_i32_0 : i32, i32
  }
  func.func @transform_3(%arg0: i32) -> (i32, i32) {
    %c0_i32 = arith.constant 0 : i32
    %c0_i32_0 = arith.constant 0 : i32
    %c0_i32_1 = arith.constant 0 : i32
    return %c0_i32, %c0_i32_0 : i32, i32
  }
  func.func @transform_4(%arg0: i32) -> (i32, i32) {
    %c0_i32 = arith.constant 0 : i32
    %c0_i32_0 = arith.constant 0 : i32
    %c0_i32_1 = arith.constant 0 : i32
    return %c0_i32, %c0_i32_0 : i32, i32
  }
  func.func @transform_5(%arg0: i32) -> (i32, i32) {
    %c0_i32 = arith.constant 0 : i32
    %c0_i32_0 = arith.constant 0 : i32
    %c0_i32_1 = arith.constant 0 : i32
    return %c0_i32, %c0_i32_0 : i32, i32
  }
  func.func @transform_6(%arg0: i32) -> (i32, i32) {
    %c0_i32 = arith.constant 0 : i32
    %c0_i32_0 = arith.constant 0 : i32
    %c0_i32_1 = arith.constant 0 : i32
    return %c0_i32, %c0_i32_0 : i32, i32
  }
  func.func @transform_7(%arg0: i32) -> (i32, i32) {
    %c0_i32 = arith.constant 0 : i32
    %c0_i32_0 = arith.constant 0 : i32
    return %arg0, %c0_i32 : i32, i32
  }
}

</mosaic_0001>

<bundles_post_ra>
// kernel: tpu_custom_call.1
= control target key start
LH: loop header
LB: loop body
LE: loop exit
PB: predicated region body
PF: predicated region fallthrough
CT: control target
= control target key end

     0   :  { %12 = vsyncpa [#allocation3], 0  ;;  %s2018_s0 = inlined_call_operand.hbm [shape: f32[8,16], index: 0, kind: input, shape index: {}]   ;;  %s2019_s1 = inlined_call_operand.hbm [shape: bf16[16,512], index: 1, kind: input, shape index: {}]   ;;  %s2020_s2 = inlined_call_operand.vmem [shape: f32[1,512], index: 2, kind: input, shape index: {}]   ;;  %s2021_s3 = inlined_call_operand.hbm [shape: bf16[512,384], index: 3, kind: input, shape index: {}]   ;;  %s2022_s4 = inlined_call_operand.vmem [shape: f32[1,384], index: 4, kind: input, shape index: {}]   ;;  %s2023_s5 = inlined_call_operand.hbm [shape: bf16[384,128], index: 5, kind: input, shape index: {}]   ;;  %s2024_s6 = inlined_call_operand.vmem [shape: f32[1,128], index: 6, kind: input, shape index: {}]   ;;  %s2025_s7 = inlined_call_operand.hbm [shape: bf16[8,128], index: 7, kind: output, shape index: {}]  }
   0x1   :  { %13 = vsyncpa [#allocation6], 0 }
   0x2   :  { %14 = vsyncpa [#allocation9], 0 }
   0x3   :  { %15 = vsyncpa [#allocation4], 0  ;;  %s1868_s24 = smov [#allocation5]   ;;  %s1750_s28 = scalar_lea.hbm %s2019_s1, 512 }
   0x4   :  { %s31_s25 = sshll.u32 %s1868_s24, 4  ;;  %p1751_p0 = scmp.ne.s32.totalorder %s2019_s1, %s1750_s28  ;;  %s32_s25 = int_to_ptr.vmem [resolvable:$true] %s31_s25 }
   0x5   :  { %p1754_p1 = scmp.lt.u32.totalorder %s1750_s28, %s2019_s1 }
   0x7   :  { %p1756_p2 = pnand %p1754_p1, %p1751_p0 }
   0x9   :  { %1759 = shalt.err (!%p1756_p2)
}
   0xa   :  { %s1760_s10 = scalar_lea.vmem %s32_s25, 512  ;;  %p1765_p4 = scmp.lt.s32.totalorder %s32_s25, %s32_s25 }
   0xb   :  { %p1761_p3 = scmp.ne.s32.totalorder %s32_s25, %s1760_s10  ;;  %p1766_p5 = scmp.lt.s32.totalorder %s1760_s10, %s1760_s10 }
   0xd   :  { %p1767_p6 = por %p1766_p5, %p1765_p4 }
   0xf   :  { %p1768_p7 = pnand %p1767_p6, %p1761_p3 }
  0x11   :  { %1771 = shalt.err (!%p1768_p7)
}
  0x12   :  { %s1869_s11 = smov 256   ;;  %s1870_s12 = smov 16  }
  0x13   :  { %37 = dma.hbm_to_vmem [thread:$0]  %s2019_s1, 512, %s32_s25, [#allocation6], %s1869_s11, %s1869_s11, %s1870_s12  }
  0x14   :  { %s1871_s15 = smov [#allocation2]   ;;  %s1872_s17 = smov [#allocation7]  }
  0x15   :  { %s22_s16 = sshll.u32 %s1871_s15, 4  ;;  %s45_s18 = sshll.u32 %s1872_s17, 4  ;;  %s23_s16 = int_to_ptr.vmem [resolvable:$true] %s22_s16  ;;  %s46_s18 = int_to_ptr.vmem [resolvable:$true] %s45_s18 }
  0x16   :  { %s1772_s21 = scalar_lea.hbm %s2018_s0, 128 }
  0x17   :  { %p1773_p8 = scmp.ne.s32.totalorder %s2018_s0, %s1772_s21  ;;  %p1776_p9 = scmp.lt.u32.totalorder %s1772_s21, %s2018_s0 }
  0x19   :  { %p1778_p10 = pnand %p1776_p9, %p1773_p8 }
  0x1b   :  { %1781 = shalt.err (!%p1778_p10)
}
  0x1c   :  { %s1782_s1 = scalar_lea.vmem %s23_s16, 128  ;;  %p1787_p12 = scmp.lt.s32.totalorder %s23_s16, %s23_s16 }
  0x1d   :  { %p1783_p11 = scmp.ne.s32.totalorder %s23_s16, %s1782_s1  ;;  %p1788_p13 = scmp.lt.s32.totalorder %s1782_s1, %s1782_s1 }
  0x1f   :  { %p1789_p0 = por %p1788_p13, %p1787_p12 }
  0x21   :  { %p1790_p1 = pnand %p1789_p0, %p1783_p11 }
  0x23   :  { %1793 = shalt.err (!%p1790_p1)
}
  0x24   :  { %25 = dma.hbm_to_vmem [thread:$0]  %s2018_s0, 128, %s23_s16, [#allocation3]  }
  0x25   :  { %s1794_s30 = scalar_lea.hbm %s2021_s3, 12288 }
  0x26   :  { %p1795_p2 = scmp.ne.s32.totalorder %s2021_s3, %s1794_s30  ;;  %p1798_p3 = scmp.lt.u32.totalorder %s1794_s30, %s2021_s3 }
  0x28   :  { %p1800_p4 = pnand %p1798_p3, %p1795_p2 }
  0x2a   :  { %1803 = shalt.err (!%p1800_p4)
}
  0x2b   :  { %s1804_s12 = scalar_lea.vmem %s46_s18, 12288  ;;  %p1809_p6 = scmp.lt.s32.totalorder %s46_s18, %s46_s18 }
  0x2c   :  { %p1805_p5 = scmp.ne.s32.totalorder %s46_s18, %s1804_s12  ;;  %p1810_p7 = scmp.lt.s32.totalorder %s1804_s12, %s1804_s12 }
  0x2e   :  { %p1811_p8 = por %p1810_p7, %p1809_p6 }
  0x30   :  { %p1812_p9 = pnand %p1811_p8, %p1805_p5 }
  0x32   :  { %1815 = shalt.err (!%p1812_p9)
}
  0x33   :  { %s1873_s0 = smov 192   ;;  %s1874_s13 = smov 12  }
  0x34   :  { %51 = dma.hbm_to_vmem [thread:$0]  %s2021_s3, 12288, %s46_s18, [#allocation6], %s1873_s0, %s1873_s0, %s1874_s13  }
  0x35   :  { %s1875_s16 = smov [#allocation8]   ;;  %s1816_s21 = scalar_lea.hbm %s2023_s5, 3072 }
  0x36   :  { %s59_s17 = sshll.u32 %s1875_s16, 4  ;;  %p1817_p10 = scmp.ne.s32.totalorder %s2023_s5, %s1816_s21  ;;  %s60_s17 = int_to_ptr.vmem [resolvable:$true] %s59_s17 }
  0x37   :  { %p1820_p11 = scmp.lt.u32.totalorder %s1816_s21, %s2023_s5 }
  0x39   :  { %p1822_p12 = pnand %p1820_p11, %p1817_p10 }
  0x3b   :  { %1825 = shalt.err (!%p1822_p12)
}
  0x3c   :  { %s1826_s1 = scalar_lea.vmem %s60_s17, 3072  ;;  %p1831_p0 = scmp.lt.s32.totalorder %s60_s17, %s60_s17 }
  0x3d   :  { %p1827_p13 = scmp.ne.s32.totalorder %s60_s17, %s1826_s1  ;;  %p1832_p1 = scmp.lt.s32.totalorder %s1826_s1, %s1826_s1 }
  0x3f   :  { %p1833_p2 = por %p1832_p1, %p1831_p0 }
  0x41   :  { %p1834_p3 = pnand %p1833_p2, %p1827_p13 }
  0x43   :  { %1837 = shalt.err (!%p1834_p3)
}
  0x44   :  { %s1876_s3 = smov 64   ;;  %s1877_s18 = smov 4  }
  0x45   :  { %65 = dma.hbm_to_vmem [thread:$0]  %s2023_s5, 3072, %s60_s17, [#allocation9], %s1876_s3, %s1876_s3, %s1877_s18  }
  0x46   :  { %1860 = dma.done.wait [#allocation3], 128  }
  0x47   :  { %1861 = vsyncadd [#allocation3], 4294967168 }
  0x48   :  { %1862 = dma.done.wait [#allocation6], 12800  }
  0x49   :  { %1863 = vsyncadd [#allocation6], 4294954496 }
  0x4a   :  { %1864 = dma.done.wait [#allocation9], 3072  }
  0x4b   :  { %1865 = vsyncadd [#allocation9], 4294964224  ;;  %v1878_v0 = vmov 0   ;;  %v1590_v1 = vld [vmem:[#allocation5 + $0x4] ss:$16 sps:$4 sm:$0xff]   ;;  %v81_v3 = vld [vmem:[#allocation2] sm:$0xff]  ;;  %v89_v57 = vlaneseq }
  0x4c   :  { %165 = vmatprep.mubr.bf16.mxu0 %v1878_v0  ;;  %206 = vmatprep.mubr.bf16.mxu1 %v1878_v0  ;;  %v1592_v2 = vld [vmem:[#allocation5] ss:$16 sps:$4 sm:$0xff]   ;;  %v82_v4 = vpack.c.bf16 %v81_v3, %v81_v3  ;;  %v1593_v5 = vld [vmem:[#allocation5 + $0xc] ss:$16 sps:$4 sm:$0xff]   ;;  %v1595_v6 = vld [vmem:[#allocation5 + $0x8] ss:$16 sps:$4 sm:$0xff]  }
  0x4d   :  { %133 = vmatprep.subr.bf16.mxu0 %v1590_v1  ;;  %vm129_vm0 = vcmask 130048   ;;  %v1596_v7 = vld [vmem:[#allocation7] ss:$12 sps:$4 sm:$0xff]   ;;  %174 = vmatprep.subr.bf16.mxu1 %v1593_v5  ;;  %v1598_v8 = vld [vmem:[#allocation7 + $0x4] ss:$12 sps:$4 sm:$0xff]   ;;  %v1970_v58 = vshrl.u32 %v89_v57, 7 }
  0x4e   :  { %134 = vmatpush1.bf16.msra.mxu0 %v1592_v2  ;;  %175 = vmatpush1.bf16.msra.mxu1 %v1595_v6  ;;  %v1601_v9 = vld [vmem:[#allocation7 + $0x1c] ss:$12 sps:$4 sm:$0xff]   ;;  %v1599_v10 = vld [vmem:[#allocation7 + $0x18] ss:$12 sps:$4 sm:$0xff]   ;;  %v1604_v11 = vld [vmem:[#allocation7 + $0x34] ss:$12 sps:$4 sm:$0xff]  }
  0x4f   :  { %880 = vmatprep.subr.bf16.mxu0 %v1598_v8  ;;  %v1602_v12 = vld [vmem:[#allocation7 + $0x30] ss:$12 sps:$4 sm:$0xff]   ;;  %v1607_v13 = vld [vmem:[#allocation7 + $0x4c] ss:$12 sps:$4 sm:$0xff]   ;;  %v1605_v14 = vld [vmem:[#allocation7 + $0x48] ss:$12 sps:$4 sm:$0xff]  }
  0x50   :  { %v1610_v15 = vld [vmem:[#allocation7 + $0x64] ss:$12 sps:$4 sm:$0xff]   ;;  %v1623_v16 = vld [vmem:[#allocation7 + $0xc8] ss:$12 sps:$4 sm:$0xff]   ;;  %v1608_v18 = vld [vmem:[#allocation7 + $0x60] ss:$12 sps:$4 sm:$0xff]  }
  0x51   :  { %1352 = vmatmul.mubr.msk.bf16.vlgmr.msra.gmra.mrb[0].mxu0 %vm129_vm0, %v82_v4  ;;  %1353 = vmatmul.mubr.msk.bf16.vlgmr.msra.gmra.mrb[0].mxu1 %vm129_vm0, %v82_v4  ;;  %v1624_v17 = vld [vmem:[#allocation7 + $0x8] ss:$12 sps:$4 sm:$0xff]   ;;  %v1628_v20 = vld [vmem:[#allocation7 + $0xe0] ss:$12 sps:$4 sm:$0xff]   ;;  %v1611_v22 = vld [vmem:[#allocation7 + $0x78] ss:$12 sps:$4 sm:$0xff]  }
  0x52   :  { %881 = vmatpush1.bf16.msra.mxu0 %v1596_v7  ;;  %1475 = vmatprep.subr.bf16.mxu1 %v1623_v16  ;;  %v1613_v19 = vld [vmem:[#allocation7 + $0x7c] ss:$12 sps:$4 sm:$0xff]   ;;  %v1629_v21 = vld [vmem:[#allocation7 + $0x20] ss:$12 sps:$4 sm:$0xff]   ;;  %v1633_v23 = vld [vmem:[#allocation7 + $0xf8] ss:$12 sps:$4 sm:$0xff]  }
  0x53   :  { %882 = vmatprep.subr.bf16.mxu0 %v1601_v9  ;;  %1476 = vmatpush3.bf16.msra.mxu1 %v1624_v17  ;;  %v1634_v24 = vld [vmem:[#allocation7 + $0x38] ss:$12 sps:$4 sm:$0xff]   ;;  %v1616_v25 = vld [vmem:[#allocation7 + $0x94] ss:$12 sps:$4 sm:$0xff]   ;;  %v1638_v26 = vld [vmem:[#allocation7 + $0x110] ss:$12 sps:$4 sm:$0xff]  }
  0x54   :  { %1477 = vmatprep.subr.bf16.mxu1 %v1628_v20  ;;  %v1639_v27 = vld [vmem:[#allocation7 + $0x50] ss:$12 sps:$4 sm:$0xff]   ;;  %v1619_v29 = vld [vmem:[#allocation7 + $0xac] ss:$12 sps:$4 sm:$0xff]   ;;  %v1643_v30 = vld [vmem:[#allocation7 + $0x128] ss:$12 sps:$4 sm:$0xff]  }
  0x55   :  { %v1614_v28 = vld [vmem:[#allocation7 + $0x90] ss:$12 sps:$4 sm:$0xff]   ;;  %v1644_v31 = vld [vmem:[#allocation7 + $0x68] ss:$12 sps:$4 sm:$0xff]   ;;  %v1648_v34 = vld [vmem:[#allocation7 + $0x140] ss:$12 sps:$4 sm:$0xff]  }
  0x56   :  { %883 = vmatpush1.bf16.msra.mxu0 %v1599_v10  ;;  %v1617_v32 = vld [vmem:[#allocation7 + $0xa8] ss:$12 sps:$4 sm:$0xff]   ;;  %v1622_v33 = vld [vmem:[#allocation7 + $0xc4] ss:$12 sps:$4 sm:$0xff]   ;;  %v1620_v35 = vld [vmem:[#allocation7 + $0xc0] ss:$12 sps:$4 sm:$0xff]  }
  0x57   :  { %884 = vmatprep.subr.bf16.mxu0 %v1604_v11  ;;  %1478 = vmatpush3.bf16.msra.mxu1 %v1629_v21  ;;  %v1649_v36 = vld [vmem:[#allocation7 + $0x80] ss:$12 sps:$4 sm:$0xff]   ;;  %v1627_v37 = vld [vmem:[#allocation7 + $0xdc] ss:$12 sps:$4 sm:$0xff]   ;;  %v1625_v38 = vld [vmem:[#allocation7 + $0xd8] ss:$12 sps:$4 sm:$0xff]  }
  0x58   :  { %1479 = vmatprep.subr.bf16.mxu1 %v1633_v23  ;;  %v1632_v39 = vld [vmem:[#allocation7 + $0xf4] ss:$12 sps:$4 sm:$0xff]   ;;  %v1630_v40 = vld [vmem:[#allocation7 + $0xf0] ss:$12 sps:$4 sm:$0xff]   ;;  %v1637_v41 = vld [vmem:[#allocation7 + $0x10c] ss:$12 sps:$4 sm:$0xff]  }
  0x59   :  { %v1635_v42 = vld [vmem:[#allocation7 + $0x108] ss:$12 sps:$4 sm:$0xff]   ;;  %v1642_v43 = vld [vmem:[#allocation7 + $0x124] ss:$12 sps:$4 sm:$0xff]   ;;  %v1640_v44 = vld [vmem:[#allocation7 + $0x120] ss:$12 sps:$4 sm:$0xff]  }
  0x5a   :  { %885 = vmatpush1.bf16.msra.mxu0 %v1602_v12  ;;  %v1647_v45 = vld [vmem:[#allocation7 + $0x13c] ss:$12 sps:$4 sm:$0xff]   ;;  %v1645_v46 = vld [vmem:[#allocation7 + $0x138] ss:$12 sps:$4 sm:$0xff]   ;;  %v1652_v47 = vld [vmem:[#allocation7 + $0x154] ss:$12 sps:$4 sm:$0xff]  }
  0x5b   :  { %886 = vmatprep.subr.bf16.mxu0 %v1607_v13  ;;  %1480 = vmatpush3.bf16.msra.mxu1 %v1634_v24  ;;  %v1653_v48 = vld [vmem:[#allocation7 + $0x158] ss:$12 sps:$4 sm:$0xff]   ;;  %v1650_v49 = vld [vmem:[#allocation7 + $0x150] ss:$12 sps:$4 sm:$0xff]   ;;  %v1655_v53 = vld [vmem:[#allocation7 + $0x168] ss:$12 sps:$4 sm:$0xff]  }
  0x5c   :  { %1481 = vmatprep.subr.bf16.mxu1 %v1638_v26  ;;  %v1654_v50 = vld [vmem:[#allocation7 + $0x98] ss:$12 sps:$4 sm:$0xff]   ;;  %v1658_v52 = vld [vmem:[#allocation7 + $0x170] ss:$12 sps:$4 sm:$0xff]   ;;  %v1663_v56 = vld [vmem:[#allocation7 + $0x248] ss:$12 sps:$4 sm:$0xff]  }
  0x5d   :  { %v1657_v51 = vld [vmem:[#allocation7 + $0x16c] ss:$12 sps:$4 sm:$0xff]   ;;  %v1659_v54 = vld [vmem:[#allocation7 + $0xb0] ss:$12 sps:$4 sm:$0xff]   ;;  %v91_v59 = vsub.s32 0, %v1970_v58  ;;  %v95_v61 = vsub.s32 1, %v1970_v58 }
  0x5e   :  { %887 = vmatpush1.bf16.msra.mxu0 %v1605_v14  ;;  %v1662_v55 = vld [vmem:[#allocation7 + $0x184] ss:$12 sps:$4 sm:$0xff]   ;;  %v1976_v60 = vld [vmem:[%s2020_s2] sm:$0xf]  ;;  %v103_v62 = vsub.s32 3, %v1970_v58  ;;  %vm1880_vm1 = vmmov 0  }
  0x5f   :  { %888 = vmatprep.subr.bf16.mxu0 %v1610_v15  ;;  %1482 = vmatpush3.bf16.msra.mxu1 %v1639_v27  ;;  %v92_v63 = vrot.slane %v1976_v60, %v91_v59  ;;  %v96_v0 = vrot.slane %v1976_v60, %v95_v61  ;;  %v1660_v16 = vld [vmem:[#allocation7 + $0x180] ss:$12 sps:$4 sm:$0xff]   ;;  %v1664_v17 = vld [vmem:[#allocation7 + $0x188] ss:$12 sps:$4 sm:$0xff]   ;;  %v1665_v23 = vld [vmem:[#allocation7 + $0x198] ss:$12 sps:$4 sm:$0xff]  }
  0x60   :  { %1483 = vmatprep.subr.bf16.mxu1 %v1643_v30  ;;  %v104_v2 = vrot.slane %v1976_v60, %v103_v62  ;;  %v1667_v20 = vld [vmem:[#allocation7 + $0x19c] ss:$12 sps:$4 sm:$0xff]   ;;  %v1668_v21 = vld [vmem:[#allocation7 + $0x260] ss:$12 sps:$4 sm:$0xff]   ;;  %v1673_v26 = vld [vmem:[#allocation7 + $0x278] ss:$12 sps:$4 sm:$0xff]  }
  0x61   :  { %v1669_v24 = vld [vmem:[#allocation7 + $0x1a0] ss:$12 sps:$4 sm:$0xff]   ;;  %v1670_v27 = vld [vmem:[#allocation7 + $0x1b0] ss:$12 sps:$4 sm:$0xff]   ;;  %v1703_v57 = vld [vmem:[#allocation7 + $0x258] ss:$12 sps:$4 sm:$0xff]  }
  0x62   :  { %889 = vmatpush1.bf16.msra.mxu0 %v1608_v18  ;;  %v1678_v30 = vld [vmem:[#allocation7 + $0x290] ss:$12 sps:$4 sm:$0xff]   ;;  %s1881_s8 = smov [#allocation10]  }
  0x63   :  { %890 = vmatprep.subr.bf16.mxu0 %v1613_v19  ;;  %1484 = vmatpush3.bf16.msra.mxu1 %v1644_v31  ;;  %v1675_v31 = vld [vmem:[#allocation7 + $0x1c8] ss:$12 sps:$4 sm:$0xff]   ;;  %v1706_v62 = vld [vmem:[#allocation7 + $0x270] ss:$12 sps:$4 sm:$0xff]   ;;  %s1337_s9 = sshll.u32 %s1881_s8, 4  ;;  %s1338_s9 = int_to_ptr.vmem [resolvable:$true] %s1337_s9 }
  0x64   :  { %1485 = vmatprep.subr.bf16.mxu1 %v1648_v34  ;;  %v1683_v34 = vld [vmem:[#allocation7 + $0x2a8] ss:$12 sps:$4 sm:$0xff]   ;;  %s1838_s10 = scalar_lea.vmem %s1338_s9, 64  ;;  %p1843_p5 = scmp.lt.s32.totalorder %s1338_s9, %s1338_s9 }
  0x65   :  { %p1839_p4 = scmp.ne.s32.totalorder %s1338_s9, %s1838_s10  ;;  %p1844_p6 = scmp.lt.s32.totalorder %s1838_s10, %s1838_s10 }
  0x66   :  { %891 = vmatpush1.bf16.msra.mxu0 %v1611_v22 }
  0x67   :  { %892 = vmatprep.subr.bf16.mxu0 %v1616_v25  ;;  %1486 = vmatpush3.bf16.msra.mxu1 %v1649_v36  ;;  %v1672_v25 = vld [vmem:[#allocation7 + $0x1b4] ss:$12 sps:$4 sm:$0xff]   ;;  %p1845_p7 = por %p1844_p6, %p1843_p5 }
  0x68   :  { %1487 = vmatprep.subr.bf16.mxu1 %v1653_v48  ;;  %v1680_v36 = vld [vmem:[#allocation7 + $0x1e0] ss:$12 sps:$4 sm:$0xff]  }
  0x69   :  { %v1697_v48 = vld [vmem:[#allocation7 + $0x22c] ss:$12 sps:$4 sm:$0xff]   ;;  %p1846_p8 = pnand %p1845_p7, %p1839_p4 }
  0x6a   :  { %893 = vmatpush1.bf16.msra.mxu0 %v1614_v28  ;;  %v1674_v28 = vld [vmem:[#allocation7 + $0x1b8] ss:$12 sps:$4 sm:$0xff]  }
  0x6b   :  { %894 = vmatprep.subr.bf16.mxu0 %v1619_v29  ;;  %1488 = vmatpush3.bf16.msra.mxu1 %v1654_v50  ;;  %v1677_v29 = vld [vmem:[#allocation7 + $0x1cc] ss:$12 sps:$4 sm:$0xff]  }
  0x6c   :  { %1489 = vmatprep.subr.bf16.mxu1 %v1658_v52  ;;  %v1699_v52 = vld [vmem:[#allocation7 + $0x230] ss:$12 sps:$4 sm:$0xff]  }
  0x6e   :  { %895 = vmatpush1.bf16.msra.mxu0 %v1617_v32  ;;  %v1679_v32 = vld [vmem:[#allocation7 + $0x1d0] ss:$12 sps:$4 sm:$0xff]  }
  0x6f   :  { %896 = vmatprep.subr.bf16.mxu0 %v1622_v33  ;;  %1490 = vmatpush3.bf16.msra.mxu1 %v1659_v54  ;;  %v1682_v33 = vld [vmem:[#allocation7 + $0x1e4] ss:$12 sps:$4 sm:$0xff]  }
  0x70   :  { %1497 = vmatprep.subr.bf16.mxu1 %v1663_v56  ;;  %v1705_v56 = vld [vmem:[#allocation7 + $0x25c] ss:$12 sps:$4 sm:$0xff]  }
  0x72   :  { %897 = vmatpush1.bf16.msra.mxu0 %v1620_v35  ;;  %v99_v35 = vsub.s32 2, %v1970_v58  ;;  %v1742_v58 = vld [vmem:[#allocation8 + $0x90] sm:$0xff]  }
  0x73   :  { %898 = vmatprep.subr.bf16.mxu0 %v1627_v37  ;;  %v1684_v37 = vld [vmem:[#allocation7 + $0x1e8] ss:$12 sps:$4 sm:$0xff]  }
  0x76   :  { %899 = vmatpush1.bf16.msra.mxu0 %v1625_v38  ;;  %v1687_v38 = vld [vmem:[#allocation7 + $0x1fc] ss:$12 sps:$4 sm:$0xff]  }
  0x77   :  { %900 = vmatprep.subr.bf16.mxu0 %v1632_v39  ;;  %v1688_v39 = vld [vmem:[#allocation7 + $0x2c0] ss:$12 sps:$4 sm:$0xff]  }
  0x7a   :  { %901 = vmatpush1.bf16.msra.mxu0 %v1630_v40  ;;  %v100_v40 = vrot.slane %v1976_v60, %v99_v35  ;;  %v1708_v60 = vld [vmem:[#allocation7 + $0x274] ss:$12 sps:$4 sm:$0xff]  }
  0x7b   :  { %902 = vmatprep.subr.bf16.mxu0 %v1637_v41  ;;  %v1685_v41 = vld [vmem:[#allocation7 + $0x1f8] ss:$12 sps:$4 sm:$0xff]  }
  0x7e   :  { %903 = vmatpush1.bf16.msra.mxu0 %v1635_v42  ;;  %v1689_v42 = vld [vmem:[#allocation7 + $0x200] ss:$12 sps:$4 sm:$0xff]  }
  0x7f   :  { %904 = vmatprep.subr.bf16.mxu0 %v1642_v43  ;;  %v1692_v43 = vld [vmem:[#allocation7 + $0x214] ss:$12 sps:$4 sm:$0xff]  }
  0x82   :  { %905 = vmatpush1.bf16.msra.mxu0 %v1640_v44  ;;  %v1693_v44 = vld [vmem:[#allocation7 + $0x2d8] ss:$12 sps:$4 sm:$0xff]  }
  0x83   :  { %906 = vmatprep.subr.bf16.mxu0 %v1647_v45 }
  0x86   :  { %907 = vmatpush1.bf16.msra.mxu0 %v1645_v46  ;;  %v1690_v46 = vld [vmem:[#allocation7 + $0x210] ss:$12 sps:$4 sm:$0xff]  }
  0x87   :  { %908 = vmatprep.subr.bf16.mxu0 %v1652_v47  ;;  %v1694_v47 = vld [vmem:[#allocation7 + $0x218] ss:$12 sps:$4 sm:$0xff]  }
  0x8a   :  { %909 = vmatpush1.bf16.msra.mxu0 %v1650_v49  ;;  %v1698_v49 = vld [vmem:[#allocation7 + $0x2f0] ss:$12 sps:$4 sm:$0xff]  }
  0x8b   :  { %910 = vmatprep.subr.bf16.mxu0 %v1657_v51  ;;  %v1695_v51 = vld [vmem:[#allocation7 + $0x228] ss:$12 sps:$4 sm:$0xff]  }
  0x8e   :  { %911 = vmatpush1.bf16.msra.mxu0 %v1655_v53  ;;  %v1702_v53 = vld [vmem:[#allocation7 + $0x244] ss:$12 sps:$4 sm:$0xff]  }
  0x8f   :  { %921 = vmatprep.subr.bf16.mxu0 %v1662_v55  ;;  %v1700_v55 = vld [vmem:[#allocation7 + $0x240] ss:$12 sps:$4 sm:$0xff]  }
 0x124   :  { %v167_v1 = vpop.f32.mrb[0].mxu0  ;;  %v1987_v7 = vpop.f32.mrb[0].mxu1 }
 0x125   :  { %v168_v3 = vadd.f32 %v167_v1, %v92_v63  ;;  %v169_v4 = vpop.f32.mrb[1].mxu0  ;;  %v210_v10 = vpop.f32.mrb[1].mxu1  ;;  %v209_v45 = vadd.f32 %v1987_v7, %v100_v40  ;;  %v1711_v63 = vld [vmem:[#allocation7 + $0x28c] ss:$12 sps:$4 sm:$0xff]   ;;  %v1714_v1 = vld [vmem:[#allocation7 + $0x2a4] ss:$12 sps:$4 sm:$0xff]  }
 0x126   :  { %v170_v5 = vadd.f32 %v169_v4, %v96_v0  ;;  %v171_v6 = vpop.f32.mrb[2].mxu0  ;;  %v211_v12 = vadd.f32 %v210_v10, %v104_v2  ;;  %v212_v13 = vpop.f32.mrb[2].mxu1  ;;  %v1709_v0 = vld [vmem:[#allocation7 + $0x288] ss:$12 sps:$4 sm:$0xff]   ;;  %v1712_v2 = vld [vmem:[#allocation7 + $0x2a0] ss:$12 sps:$4 sm:$0xff]  }
 0x127   :  { %v215_v8 = vmax.f32 %v168_v3, 0.0  ;;  %v172_v9 = vpop.f32.mrb[3].mxu0  ;;  %v213_v14 = vpop.f32.mrb[3].mxu1  ;;  %v217_v50 = vmax.f32 %v209_v45, 0.0  ;;  %v1717_v3 = vld [vmem:[#allocation7 + $0x2bc] ss:$12 sps:$4 sm:$0xff]  }
 0x128   :  { %v216_v11 = vmax.f32 %v170_v5, 0.0  ;;  %v218_v18 = vmax.f32 %v211_v12, 0.0  ;;  %v1715_v4 = vld [vmem:[#allocation7 + $0x2b8] ss:$12 sps:$4 sm:$0xff]   ;;  %v1720_v5 = vld [vmem:[#allocation7 + $0x2d4] ss:$12 sps:$4 sm:$0xff]  }
 0x129   :  { %v219_v19 = vpack.c.bf16 %v215_v8, %v215_v8  ;;  %v221_v54 = vpack.c.bf16 %v217_v50, %v217_v50  ;;  %v1718_v6 = vld [vmem:[#allocation7 + $0x2d0] ss:$12 sps:$4 sm:$0xff]   ;;  %v1723_v7 = vld [vmem:[#allocation7 + $0x2ec] ss:$12 sps:$4 sm:$0xff]   ;;  %v1721_v8 = vld [vmem:[#allocation7 + $0x2e8] ss:$12 sps:$4 sm:$0xff]  }
 0x12a   :  { %v220_v15 = vpack.c.bf16 %v216_v11, %v216_v11  ;;  %v222_v22 = vpack.c.bf16 %v218_v18, %v218_v18  ;;  %v1724_v9 = vld [vmem:[#allocation8 + $0x40] sm:$0xff]   ;;  %v1726_v11 = vld [vmem:[#allocation8 + $0x48] sm:$0xff]   ;;  %v1728_v13 = vld [vmem:[#allocation8 + $0x50] sm:$0xff]  }
 0x12b   :  { %v1725_v10 = vld [vmem:[#allocation8] sm:$0xff]   ;;  %v1727_v12 = vld [vmem:[#allocation8 + $0x8] sm:$0xff]   ;;  %v1729_v14 = vld [vmem:[#allocation8 + $0x10] sm:$0xff]  }
 0x12c   :  { %912 = vmatprep.mubr.bf16.mxu0 %v220_v15  ;;  %994 = vmatprep.mubr.bf16.mxu1 %v220_v15  ;;  %v1730_v15 = vld [vmem:[#allocation8 + $0x58] sm:$0xff]   ;;  %v1733_v18 = vld [vmem:[#allocation8 + $0x20] sm:$0xff]  }
 0x12d   :  { %913 = vmatmul.mubr.bf16.vlgmr.msra.gmra.mrb[4].mxu0 %v219_v19  ;;  %995 = vmatmul.mubr.bf16.vlgmr.msra.gmra.mrb[4].mxu1 %v219_v19  ;;  %v1734_v19 = vld [vmem:[#allocation8 + $0x68] sm:$0xff]  }
 0x12e   :  { %922 = vmatpush1.bf16.msra.mxu0 %v1660_v16  ;;  %1498 = vmatpush3.bf16.msra.mxu1 %v1664_v17  ;;  %v1731_v16 = vld [vmem:[#allocation8 + $0x18] sm:$0xff]   ;;  %v1732_v17 = vld [vmem:[#allocation8 + $0x60] sm:$0xff]  }
 0x12f   :  { %923 = vmatprep.subr.bf16.mxu0 %v1667_v20  ;;  %1499 = vmatprep.subr.bf16.mxu1 %v1668_v21  ;;  %v1735_v20 = vld [vmem:[#allocation8 + $0x28] sm:$0xff]   ;;  %v1736_v21 = vld [vmem:[#allocation8 + $0x70] sm:$0xff]  }
 0x130   :  { %1034 = vmatprep.mubr.bf16.mxu1 %v222_v22  ;;  %953 = vmatprep.mubr.bf16.mxu0 %v222_v22  ;;  %v1737_v22 = vld [vmem:[#allocation8 + $0x30] sm:$0xff]  }
 0x132   :  { %924 = vmatpush1.bf16.msra.mxu0 %v1665_v23  ;;  %1500 = vmatpush3.bf16.msra.mxu1 %v1669_v24  ;;  %v1738_v23 = vld [vmem:[#allocation8 + $0x78] sm:$0xff]  }
 0x133   :  { %925 = vmatprep.subr.bf16.mxu0 %v1672_v25  ;;  %1501 = vmatprep.subr.bf16.mxu1 %v1673_v26  ;;  %v1739_v24 = vld [vmem:[#allocation8 + $0x38] sm:$0xff]   ;;  %v1879_v25 = vmov 0.0  }
 0x136   :  { %926 = vmatpush1.bf16.msra.mxu0 %v1670_v27  ;;  %1502 = vmatpush3.bf16.msra.mxu1 %v1674_v28 }
 0x137   :  { %927 = vmatprep.subr.bf16.mxu0 %v1677_v29  ;;  %1503 = vmatprep.subr.bf16.mxu1 %v1678_v30 }
 0x13a   :  { %928 = vmatpush1.bf16.msra.mxu0 %v1675_v31  ;;  %1504 = vmatpush3.bf16.msra.mxu1 %v1679_v32  ;;  %v351_v31 = vld [vmem:[%s2022_s4] sm:$0x7] }
 0x13b   :  { %929 = vmatprep.subr.bf16.mxu0 %v1682_v33  ;;  %1505 = vmatprep.subr.bf16.mxu1 %v1683_v34  ;;  %v364_v32 = vrot.slane %v351_v31, %v99_v35 }
 0x13e   :  { %930 = vmatpush1.bf16.msra.mxu0 %v1680_v36  ;;  %1506 = vmatpush3.bf16.msra.mxu1 %v1684_v37 }
 0x13f   :  { %931 = vmatprep.subr.bf16.mxu0 %v1687_v38  ;;  %1507 = vmatprep.subr.bf16.mxu1 %v1688_v39 }
 0x142   :  { %932 = vmatpush1.bf16.msra.mxu0 %v1685_v41  ;;  %1508 = vmatpush3.bf16.msra.mxu1 %v1689_v42  ;;  %v356_v41 = vrot.slane %v351_v31, %v91_v59  ;;  %v360_v42 = vrot.slane %v351_v31, %v95_v61  ;;  %v1743_v59 = vld [vmem:[#allocation8 + $0x98] sm:$0xff]   ;;  %v1744_v61 = vld [vmem:[#allocation8 + $0xa0] sm:$0xff]  }
 0x143   :  { %933 = vmatprep.subr.bf16.mxu0 %v1692_v43  ;;  %1509 = vmatprep.subr.bf16.mxu1 %v1693_v44 }
 0x146   :  { %934 = vmatpush1.bf16.msra.mxu0 %v1690_v46  ;;  %1510 = vmatpush3.bf16.msra.mxu1 %v1694_v47 }
 0x147   :  { %935 = vmatprep.subr.bf16.mxu0 %v1697_v48  ;;  %1511 = vmatprep.subr.bf16.mxu1 %v1698_v49 }
 0x14a   :  { %936 = vmatpush1.bf16.msra.mxu0 %v1695_v51  ;;  %1512 = vmatpush3.bf16.msra.mxu1 %v1699_v52  ;;  %v1740_v51 = vld [vmem:[#allocation8 + $0x80] sm:$0xff]  }
 0x14b   :  { %937 = vmatprep.subr.bf16.mxu0 %v1702_v53  ;;  %1519 = vmatprep.subr.bf16.mxu1 %v1724_v9  ;;  %v1741_v53 = vld [vmem:[#allocation8 + $0x88] sm:$0xff]  }
 0x14d   :  { %1035 = vmatmul.mubr.bf16.vlgmr.msra.gmra.mrb[8].mxu1 %v221_v54 }
 0x14e   :  { %938 = vmatpush1.bf16.msra.mxu0 %v1700_v55  ;;  %1520 = vmatpush3.bf16.msra.mxu1 %v1725_v10  ;;  %v1746_v55 = vld [vmem:[#allocation8 + $0xb0] sm:$0xff]  }
 0x14f   :  { %939 = vmatprep.subr.bf16.mxu0 %v1705_v56  ;;  %1521 = vmatprep.subr.bf16.mxu1 %v1726_v11  ;;  %v1747_v56 = vld [vmem:[#allocation8 + $0xb8] sm:$0xff]  }
 0x152   :  { %940 = vmatpush1.bf16.msra.mxu0 %v1703_v57  ;;  %1522 = vmatpush3.bf16.msra.mxu1 %v1727_v12 }
 0x153   :  { %941 = vmatprep.subr.bf16.mxu0 %v1708_v60  ;;  %1523 = vmatprep.subr.bf16.mxu1 %v1728_v13 }
 0x156   :  { %942 = vmatpush1.bf16.msra.mxu0 %v1706_v62  ;;  %1524 = vmatpush3.bf16.msra.mxu1 %v1729_v14 }
 0x157   :  { %943 = vmatprep.subr.bf16.mxu0 %v1711_v63  ;;  %1525 = vmatprep.subr.bf16.mxu1 %v1730_v15 }
 0x15a   :  { %944 = vmatpush1.bf16.msra.mxu0 %v1709_v0  ;;  %1526 = vmatpush3.bf16.msra.mxu1 %v1731_v16 }
 0x15b   :  { %945 = vmatprep.subr.bf16.mxu0 %v1714_v1  ;;  %1527 = vmatprep.subr.bf16.mxu1 %v1732_v17 }
 0x15e   :  { %946 = vmatpush1.bf16.msra.mxu0 %v1712_v2  ;;  %1528 = vmatpush3.bf16.msra.mxu1 %v1733_v18 }
 0x15f   :  { %947 = vmatprep.subr.bf16.mxu0 %v1717_v3  ;;  %1529 = vmatprep.subr.bf16.mxu1 %v1734_v19  ;;  %v1450_v3 = vld [vmem:[%s2024_s6] ss:$0 sm:$0xff] }
 0x162   :  { %948 = vmatpush1.bf16.msra.mxu0 %v1715_v4  ;;  %1530 = vmatpush3.bf16.msra.mxu1 %v1735_v20 }
 0x163   :  { %949 = vmatprep.subr.bf16.mxu0 %v1720_v5  ;;  %1531 = vmatprep.subr.bf16.mxu1 %v1736_v21 }
 0x166   :  { %950 = vmatpush1.bf16.msra.mxu0 %v1718_v6  ;;  %1532 = vmatpush3.bf16.msra.mxu1 %v1737_v22 }
 0x167   :  { %951 = vmatprep.subr.bf16.mxu0 %v1723_v7  ;;  %1533 = vmatprep.subr.bf16.mxu1 %v1738_v23 }
 0x16a   :  { %952 = vmatpush1.bf16.msra.mxu0 %v1721_v8  ;;  %1534 = vmatpush3.bf16.msra.mxu1 %v1739_v24 }
 0x16b   :  { %1550 = vmatprep.subr.bf16.mxu1 %v1879_v25 }
 0x16d   :  { %954 = vmatmul.mubr.bf16.vlgmr.msra.gmra.mrb[4].mxu0 %v221_v54  ;;  %v1745_v54 = vld [vmem:[#allocation8 + $0xa8] sm:$0xff]  }
 0x200   :  { %v1491_v26 = vpop.f32.mrb[4].mxu1 }
 0x201   :  { %v1492_v27 = vpop.f32.mrb[5].mxu1 }
 0x202   :  { %v1493_v28 = vadd.f32 %v1492_v27, %v1491_v26  ;;  %v1494_v29 = vpop.f32.mrb[6].mxu1 }
 0x203   :  { %v1495_v30 = vpop.f32.mrb[7].mxu1 }
 0x204   :  { %v997_v36 = vadd.f32 %v1493_v28, %v364_v32 }
 0x220   :  { %v1513_v33 = vpop.f32.mrb[8].mxu1 }
 0x221   :  { %v1514_v34 = vpop.f32.mrb[9].mxu1 }
 0x222   :  { %v1515_v37 = vadd.f32 %v1514_v34, %v1513_v33  ;;  %v1516_v38 = vpop.f32.mrb[10].mxu1 }
 0x223   :  { %v1517_v39 = vpop.f32.mrb[11].mxu1 }
 0x224   :  { %v1037_v40 = vadd.f32 %v1515_v37, %v997_v36 }
 0x226   :  { %v1044_v57 = vmax.f32 %v1037_v40, 0.0 }
 0x228   :  { %v1047_v60 = vpack.c.bf16 %v1044_v57, %v1044_v57 }
 0x240   :  { %v955_v43 = vpop.f32.mrb[4].mxu0 }
 0x241   :  { %v1570_v44 = vadd.f32 %v955_v43, %v356_v41  ;;  %v957_v45 = vpop.f32.mrb[5].mxu0 }
 0x242   :  { %v1571_v46 = vadd.f32 %v957_v45, %v360_v42  ;;  %v959_v47 = vpop.f32.mrb[6].mxu0 }
 0x243   :  { %v1042_v48 = vmax.f32 %v1570_v44, 0.0  ;;  %v960_v35 = vpop.f32.mrb[7].mxu0 }
 0x244   :  { %v1043_v49 = vmax.f32 %v1571_v46, 0.0 }
 0x245   :  { %v1045_v52 = vpack.c.bf16 %v1042_v48, %v1042_v48 }
 0x246   :  { %v1046_v50 = vpack.c.bf16 %v1043_v49, %v1043_v49 }
 0x248   :  { %1279 = vmatprep.mubr.bf16.mxu1 %v1046_v50 }
 0x249   :  { %1280 = vmatmul.mubr.bf16.vlgmr.msra.gmra.mrb[12].mxu1 %v1045_v52 }
 0x24a   :  { %1551 = vmatpush3.bf16.msra.mxu1 %v1740_v51  ;;  %1566 = vmatprep.mubr.msk.bf16.mxu1 %vm1880_vm1, %v1879_v25 }
 0x24b   :  { %1552 = vmatprep.subr.bf16.mxu1 %v1879_v25 }
 0x24e   :  { %1553 = vmatpush3.bf16.msra.mxu1 %v1741_v53 }
 0x24f   :  { %1554 = vmatprep.subr.bf16.mxu1 %v1879_v25 }
 0x252   :  { %1555 = vmatpush3.bf16.msra.mxu1 %v1742_v58 }
 0x253   :  { %1556 = vmatprep.subr.bf16.mxu1 %v1879_v25 }
 0x256   :  { %1557 = vmatpush3.bf16.msra.mxu1 %v1743_v59 }
 0x257   :  { %1558 = vmatprep.subr.bf16.mxu1 %v1879_v25 }
 0x25a   :  { %1559 = vmatpush3.bf16.msra.mxu1 %v1744_v61 }
 0x25b   :  { %1560 = vmatprep.subr.bf16.mxu1 %v1879_v25 }
 0x25e   :  { %1561 = vmatpush3.bf16.msra.mxu1 %v1745_v54 }
 0x25f   :  { %1562 = vmatprep.subr.bf16.mxu1 %v1879_v25 }
 0x262   :  { %1563 = vmatpush3.bf16.msra.mxu1 %v1746_v55 }
 0x263   :  { %1564 = vmatprep.subr.bf16.mxu1 %v1879_v25 }
 0x266   :  { %1565 = vmatpush3.bf16.msra.mxu1 %v1747_v56 }
 0x269   :  { %1567 = vmatmul.mubr.bf16.vlgmr.msra.gmra.mrb[16].mxu1 %v1047_v60 }
 0x31c   :  { %v1535_v62 = vpop.f32.mrb[12].mxu1 }
 0x31d   :  { %v1536_v63 = vpop.f32.mrb[13].mxu1 }
 0x31e   :  { %v1537_v0 = vadd.f32 %v1536_v63, %v1535_v62  ;;  %v1538_v1 = vpop.f32.mrb[14].mxu1 }
 0x31f   :  { %v1539_v2 = vpop.f32.mrb[15].mxu1 }
 0x320   :  { %v1282_v4 = vadd.f32 %v1537_v0, %v1450_v3 }
 0x33c   :  { %v1321_v5 = vpop.f32.mrb[16].mxu1 }
 0x33d   :  { %v1322_v6 = vadd.f32 %v1321_v5, %v1282_v4  ;;  %v1568_v7 = vpop.f32.mrb[17].mxu1 }
 0x33e   :  { %v1324_v8 = vpop.f32.mrb[18].mxu1 }
 0x33f   :  { %1748 = vtanh.f32 %v1322_v6  ;;  %v1569_v9 = vpop.f32.mrb[19].mxu1 }
 0x349   :  { %v1749_v10 = vpop.eup %1748 }
 0x34a   :  { %v1328_v11 = vmul.f32 2.0, %v1749_v10 }
 0x34c   :  { %v1329_v12 = vpack.c.bf16 %v1328_v11, %v1328_v11 }
 0x34e   :  { %1330 = vst [vmem:[#allocation10] sm:$0xf] %v1329_v12 }
 0x34f   :  { %1849 = shalt.err (!%p1846_p8)
}
 0x350   :  { %s1850_s12 = scalar_lea.hbm %s2025_s7, 64 }
 0x351   :  { %p1851_p9 = scmp.ne.s32.totalorder %s2025_s7, %s1850_s12  ;;  %p1854_p10 = scmp.lt.u32.totalorder %s1850_s12, %s2025_s7 }
 0x353   :  { %p1856_p11 = pnand %p1854_p10, %p1851_p9 }
 0x355   :  { %1859 = shalt.err (!%p1856_p11)
}
 0x356   :  { %1340 = dma.vmem_to_hbm [thread:$0]  %s1338_s9, 64, %s2025_s7, [#allocation4]  }
 0x357   :  { %1866 = dma.done.wait [#allocation4], 64  }
 0x358   :  { %1867 = vsyncadd [#allocation4], 4294967232 }
 0x359   :  { %1344 = vsyncpa [#allocation3], 1 }
 0x35a   :  { %1345 = vsyncpa [#allocation6], 1 }
 0x35b   :  { %1346 = vsyncpa [#allocation9], 1 }
 0x35c   :  { %1347 = vsyncpa [#allocation4], 1 }

</bundles_post_ra>
